<compile_context>
chip_gen: v7x
topology: tpu7x:2x2x1
jax: 0.10.0
libtpu: 0.0.40
codegen_flags: <defaults>
</compile_context>

<pallas_src>
import functools
import math

import jax
import jax.numpy as jnp
from jax import lax
from jax.experimental import pallas as pl
from jax.experimental.pallas import tpu as pltpu

LN_EPS = 1e-5


def _merge_ln_matmul_kernel(x_even_ref, x_odd_ref, w0_ref, w1_ref, b_ref, o_ref):
    # x_even_ref : (rt, W2, 2C)  H-even rows of rt merged rows; features [x0 | x2]
    # x_odd_ref  : (rt, W2, 2C)  H-odd  rows of the same merged rows; features [x1 | x3]
    # w0_ref     : (2C, c2o)     gamma-folded reduction weight rows for [x0 | x2]
    # w1_ref     : (2C, c2o)     gamma-folded reduction weight rows for [x1 | x3]
    # b_ref      : (1,  c2o)     beta @ W  (f32)
    # o_ref      : (rt*W2, c2o)
    rt, w2, fh = x_even_ref.shape
    n_tok = rt * w2
    inv_c4 = 1.0 / (2 * fh)

    # Halves stay in the model dtype; the reshape to token-major 2D is a VMEM-local
    # relayout only when W2 is not sublane-aligned (Swin W2 in {28,14,7}).
    v0 = x_even_ref[...].reshape(n_tok, fh)
    v1 = x_odd_ref[...].reshape(n_tok, fh)
    v0f = v0.astype(jnp.float32)
    v1f = v1.astype(jnp.float32)

    # LayerNorm statistics over the full 4C features, from the two halves (f32 only here).
    mean = (jnp.sum(v0f, axis=-1, keepdims=True)
            + jnp.sum(v1f, axis=-1, keepdims=True)) * inv_c4
    zc0 = v0f - mean
    zc1 = v1f - mean
    var = (jnp.sum(zc0 * zc0, axis=-1, keepdims=True)
           + jnp.sum(zc1 * zc1, axis=-1, keepdims=True)) * inv_c4
    r = lax.rsqrt(var + LN_EPS)

    mm_dtype = w0_ref.dtype
    zn0 = (zc0 * r).astype(mm_dtype)
    zn1 = (zc1 * r).astype(mm_dtype)

    out = jnp.dot(zn0, w0_ref[...], preferred_element_type=jnp.float32)
    out = out + jnp.dot(zn1, w1_ref[...], preferred_element_type=jnp.float32)
    out = out + b_ref[...]
    o_ref[...] = out.astype(o_ref.dtype)


def _plan_row_tile(n_rows, w2, c_half, c_out, act_itemsize, w_itemsize):
    """Pick the merged-row tile `rt` and the compiler VMEM limit.

    Budget is derived from the device's physical VMEM (v7x: 64 MiB/core; v5e/v6e:
    128 MiB) and counts double-buffered DMA blocks for both activation operands and
    the output, the (double-buffered) constant weight operands and the in-kernel f32
    temporaries, instead of the previous optimistic 8 MiB / f32-only heuristic.
    """
    try:
        vmem_cap = int(getattr(pltpu.get_tpu_info(), "vmem_capacity_bytes"))
    except Exception:  # interpret mode / query unavailable: assume the smallest (v7x)
        vmem_cap = 64 * 1024 * 1024
    vmem_limit = min((vmem_cap * 3) // 4, 96 * 1024 * 1024)   # 48 MiB on v7x, 96 MiB on v5e/v6e
    tile_budget = (vmem_limit * 7) // 10

    t = w2
    per_row = (
        4 * t * c_half * act_itemsize               # 2 input operands x 2 pipeline buffers
        + 2 * t * c_out * act_itemsize              # output block x 2 pipeline buffers
        + 2 * t * c_half * (2 * act_itemsize + 4)   # reshaped halves + f32 centered + mm cast
        + 8 * t * c_out                             # f32 matmul accumulator / result
    )
    # Constant-index weight/bias operands: fetched once but allocated double-buffered.
    # TODO(synk): pipeline_mode=pl.Buffered(1) on these specs would reclaim one copy.
    fixed = 2 * (2 * c_half * c_out * w_itemsize + 4 * c_out)

    rt = max(1, (tile_budget - fixed) // per_row)

    sub = {1: 32, 2: 16, 4: 8}.get(act_itemsize, 8)
    m = sub // math.gcd(w2, sub)        # rt multiple of m  =>  (rt * W2) % sub == 0
    # Keep >= 2 grid steps (v7x has 2 TensorCores; grid of 1 also disables pipelining),
    # and >= 4 steps when the row count allows.
    if n_rows >= 4 * m:
        rt = min(rt, -(-n_rows // 4))
    elif n_rows >= 2 * m:
        rt = min(rt, -(-n_rows // 2))
    rt = max(m, (rt // m) * m)
    if rt >= n_rows:
        rt = n_rows                     # tiny inputs: one full block (always legal)
    return rt, vmem_limit


@functools.partial(jax.jit, static_argnames=("input_resolution",))
def patch_merging_forward(x, gamma, beta, weight_t, *, input_resolution):
    """
    x        : (B, H*W, C)
    gamma    : (4*C,)       LayerNorm weight
    beta     : (4*C,)       LayerNorm bias
    weight_t : (4*C, 2*C)   reduction weight, transposed from PyTorch's (2C, 4C)
    returns  : (B, ceil(H/2)*ceil(W/2), 2*C) in x.dtype
    """
    H, W = input_resolution
    B, L, C = x.shape
    assert L == H * W, f"Input feature has wrong size: expected {H * W}, got {L}"

    x = x.reshape(B, H, W, C)
    pad_h, pad_w = H % 2, W % 2
    if pad_h or pad_w:
        # TODO(synk): odd resolutions take the slow path — this pad is a full extra HBM
        # read+write of the activations; a masked in-kernel tail row/col would avoid it.
        x = jnp.pad(x, ((0, 0), (0, pad_h), (0, pad_w), (0, 0)))
        H, W = H + pad_h, W + pad_w

    H2, W2 = H // 2, W // 2
    c2 = 2 * C
    # Lane-dense pad only when 2C < 128 (tiny dims).  Real Swin widths (>=192) are
    # written unpadded -> no post-kernel slice pass over the output.
    c2o = 128 if c2 < 128 else c2

    # Matmul / streaming dtype: keep bf16/fp16 models in their dtype, else f32.
    mm_dtype = x.dtype if x.dtype.itemsize == 2 else jnp.float32
    w_isz = 2 if x.dtype.itemsize == 2 else 4

    # Fold the LayerNorm affine into the reduction weight (exact):
    #   LN(x) @ W = x_hat @ (diag(gamma) @ W) + (beta @ W)
    # and split its rows by H-parity: parity-0 features are [x0 | x2], parity-1 [x1 | x3].
    f32 = jnp.float32
    w_eff = gamma.astype(f32)[:, None] * weight_t.astype(f32)              # (4C, 2C)
    w_even = jnp.concatenate([w_eff[0:C], w_eff[2 * C:3 * C]], axis=0)     # rows for [x0|x2]
    w_odd = jnp.concatenate([w_eff[C:2 * C], w_eff[3 * C:4 * C]], axis=0)  # rows for [x1|x3]
    b_eff = (beta.astype(f32) @ weight_t.astype(f32)).reshape(1, c2)
    if c2o != c2:
        w_even = jnp.pad(w_even, ((0, 0), (0, c2o - c2)))
        w_odd = jnp.pad(w_odd, ((0, 0), (0, c2o - c2)))
        b_eff = jnp.pad(b_eff, ((0, 0), (0, c2o - c2)))
    w_even = w_even.astype(mm_dtype)
    w_odd = w_odd.astype(mm_dtype)

    # Free (metadata-only) view: (B*H2, 2, W2, 2C); dim 1 = H parity, last dim packs
    # [w-even C | w-odd C].  This is the only HBM pass over the activations; the same
    # array is passed twice with different parity indices (no duplicated DMA traffic).
    y = x.reshape(B * H2, 2, W2, c2)
    n_rows = B * H2
    n_tokens = n_rows * W2

    rt, vmem_limit = _plan_row_tile(n_rows, W2, c2, c2o, x.dtype.itemsize, w_isz)
    grid = (pl.cdiv(n_rows, rt),)

    cost = pl.CostEstimate(
        flops=2 * n_tokens * (4 * C) * c2o + 10 * n_tokens * 4 * C,
        transcendentals=n_tokens,
        bytes_accessed=(n_tokens * 4 * C * x.dtype.itemsize
                        + 2 * c2 * c2o * w_isz
                        + n_tokens * c2o * x.dtype.itemsize),
    )

    out = pl.pallas_call(
        _merge_ln_matmul_kernel,
        out_shape=jax.ShapeDtypeStruct((n_tokens, c2o), x.dtype),
        grid_spec=pltpu.PrefetchScalarGridSpec(
            num_scalar_prefetch=0,
            grid=grid,
            in_specs=[
                pl.BlockSpec((rt, None, W2, c2), lambda i: (i, 0, 0, 0)),  # H-even rows
                pl.BlockSpec((rt, None, W2, c2), lambda i: (i, 1, 0, 0)),  # H-odd rows
                pl.BlockSpec((c2, c2o), lambda i: (0, 0)),                 # folded W [x0|x2]
                pl.BlockSpec((c2, c2o), lambda i: (0, 0)),                 # folded W [x1|x3]
                pl.BlockSpec((1, c2o), lambda i: (0, 0)),                  # folded bias
            ],
            out_specs=pl.BlockSpec((rt * W2, c2o), lambda i: (i, 0)),
        ),
        compiler_params=pltpu.CompilerParams(
            dimension_semantics=("parallel",),
            vmem_limit_bytes=int(vmem_limit),
        ),
        cost_estimate=cost,
    )(y, y, w_even, w_odd, b_eff)

    if c2o != c2:
        out = out[:, :c2]        # only taken for tiny 2C < 128
    return out.reshape(B, H2 * W2, c2)


def _reference(x, gamma, beta, weight_t, input_resolution):
    # Pure-JAX reference matching the PyTorch module (torch feature order [x0,x1,x2,x3]).
    H, W = input_resolution
    B, L, C = x.shape
    x = x.reshape(B, H, W, C)
    pad_h, pad_w = H % 2, W % 2
    if pad_h or pad_w:
        x = jnp.pad(x, ((0, 0), (0, pad_h), (0, pad_w), (0, 0)))
        H, W = H + pad_h, W + pad_w
    x0 = x[:, 0::2, 0::2, :]
    x1 = x[:, 1::2, 0::2, :]
    x2 = x[:, 0::2, 1::2, :]
    x3 = x[:, 1::2, 1::2, :]
    xm = jnp.concatenate([x0, x1, x2, x3], axis=-1).reshape(B, -1, 4 * C)
    mean = jnp.mean(xm, axis=-1, keepdims=True)
    var = jnp.mean((xm - mean) ** 2, axis=-1, keepdims=True)
    xn = (xm - mean) / jnp.sqrt(var + LN_EPS) * gamma + beta
    return jnp.einsum("blk,kn->bln", xn, weight_t)


if __name__ == "__main__":
    key = jax.random.PRNGKey(0)
    kx, kw, kg, kb = jax.random.split(key, 4)

    def run_case(B, H, W, C, dtype, tol):
        x = jax.random.normal(kx, (B, H * W, C), dtype=jnp.float32)
        # Non-trivial LayerNorm affine so the gamma/beta -> weight/bias folding is exercised.
        gamma = 1.0 + 0.1 * jax.random.normal(kg, (4 * C,), dtype=jnp.float32)
        beta = 0.05 * jax.random.normal(kb, (4 * C,), dtype=jnp.float32)
        # reduction = Linear(4*dim, 2*dim, bias=False): PyTorch weight (2C,4C), stored transposed.
        # TODO(synk): UnifiedQuantizedLinear quantize/dequantize has no checkpointed scales
        # here; implemented as the plain linear it reduces to.
        weight_t = (jax.random.normal(kw, (2 * C, 4 * C), dtype=jnp.float32) * 0.02).T
        x = x.astype(dtype)

        out = jax.block_until_ready(
            patch_merging_forward(x, gamma, beta, weight_t, input_resolution=(H, W)))
        ref = _reference(x.astype(jnp.float32), gamma, beta, weight_t, (H, W))
        Hp, Wp = H + H % 2, W + W % 2
        assert out.shape == (B, (Hp // 2) * (Wp // 2), 2 * C), out.shape
        err = float(jnp.abs(out.astype(jnp.float32) - ref).max())
        assert err <= tol, (B, H, W, C, str(dtype), err)

    # Module config from the spec: input_resolution=(16,16), dim=C=4 -> x: (2, 256, 4).
    run_case(2, 16, 16, 4, jnp.float32, 1e-4)
    # Odd resolution: exercises the pad-to-even branch (module's F.pad fix).
    run_case(2, 15, 15, 4, jnp.float32, 1e-4)
    # W2 % 8 != 0 and a non-divisible row count: exercises the ragged (cdiv) tail block.
    run_case(3, 20, 20, 4, jnp.float32, 1e-4)
    # bf16 streaming path (real Swin dtype): bf16 HBM traffic + bf16 MXU operands.
    run_case(2, 16, 16, 8, jnp.bfloat16, 2e-2)

    print("KERNEL_OK")
</pallas_src>

<mosaic_0001>
module attributes {stable_mosaic.version = 11 : i64} {
  func.func @_merge_ln_matmul_kernel(%arg0: i32, %arg1: memref<4x1x8x8xf32, #tpu.memory_space<vmem>>, %arg2: memref<4x1x8x8xf32, #tpu.memory_space<vmem>>, %arg3: memref<8x128xf32, #tpu.memory_space<vmem>>, %arg4: memref<8x128xf32, #tpu.memory_space<vmem>>, %arg5: memref<1x128xf32, #tpu.memory_space<vmem>>, %arg6: memref<32x128xf32, #tpu.memory_space<vmem>>) attributes {dimension_semantics = [#tpu.dimension_semantics<parallel>], iteration_bounds = array<i64: 4>, scalar_prefetch = 0 : i64, scratch_operands = 0 : i64, tpu.core_type = #tpu.core_type<tc>, window_params = [{transform_indices = @transform_0, window_bounds = array<i64: 4, 1, 8, 8>}, {transform_indices = @transform_1, window_bounds = array<i64: 4, 1, 8, 8>}, {pipeline_mode = #tpu.pipeline_mode<synchronous>, transform_indices = @transform_2, window_bounds = array<i64: 8, 128>}, {pipeline_mode = #tpu.pipeline_mode<synchronous>, transform_indices = @transform_3, window_bounds = array<i64: 8, 128>}, {pipeline_mode = #tpu.pipeline_mode<synchronous>, transform_indices = @transform_4, window_bounds = array<i64: 1, 128>}, {transform_indices = @transform_5, window_bounds = array<i64: 32, 128>}]} {
    %c0 = arith.constant 0 : index
    %c0_0 = arith.constant 0 : index
    %c0_1 = arith.constant 0 : index
    %c0_2 = arith.constant 0 : index
    %0 = vector.load %arg1[%c0, %c0_0, %c0_1, %c0_2] : memref<4x1x8x8xf32, #tpu.memory_space<vmem>>, vector<4x1x8x8xf32>
    %1 = vector.shape_cast %0 : vector<4x1x8x8xf32> to vector<4x8x8xf32>
    %2 = vector.shape_cast %1 : vector<4x8x8xf32> to vector<32x8xf32>
    %c0_3 = arith.constant 0 : index
    %c0_4 = arith.constant 0 : index
    %c0_5 = arith.constant 0 : index
    %c0_6 = arith.constant 0 : index
    %3 = vector.load %arg2[%c0_3, %c0_4, %c0_5, %c0_6] : memref<4x1x8x8xf32, #tpu.memory_space<vmem>>, vector<4x1x8x8xf32>
    %4 = vector.shape_cast %3 : vector<4x1x8x8xf32> to vector<4x8x8xf32>
    %5 = vector.shape_cast %4 : vector<4x8x8xf32> to vector<32x8xf32>
    %cst = arith.constant dense<0.000000e+00> : vector<32xf32>
    %6 = vector.multi_reduction <add>, %2, %cst [1] : vector<32x8xf32> to vector<32xf32>
    %7 = vector.shape_cast %6 : vector<32xf32> to vector<32x1xf32>
    %cst_7 = arith.constant dense<0.000000e+00> : vector<32xf32>
    %8 = vector.multi_reduction <add>, %5, %cst_7 [1] : vector<32x8xf32> to vector<32xf32>
    %9 = vector.shape_cast %8 : vector<32xf32> to vector<32x1xf32>
    %10 = arith.addf %7, %9 : vector<32x1xf32>
    %cst_8 = arith.constant 6.250000e-02 : f32
    %11 = vector.broadcast %cst_8 : f32 to vector<32x1xf32>
    %12 = arith.mulf %10, %11 : vector<32x1xf32>
    %13 = vector.broadcast %12 : vector<32x1xf32> to vector<32x8xf32>
    %14 = arith.subf %2, %13 : vector<32x8xf32>
    %15 = vector.broadcast %12 : vector<32x1xf32> to vector<32x8xf32>
    %16 = arith.subf %5, %15 : vector<32x8xf32>
    %17 = arith.mulf %14, %14 : vector<32x8xf32>
    %cst_9 = arith.constant dense<0.000000e+00> : vector<32xf32>
    %18 = vector.multi_reduction <add>, %17, %cst_9 [1] : vector<32x8xf32> to vector<32xf32>
    %19 = vector.shape_cast %18 : vector<32xf32> to vector<32x1xf32>
    %20 = arith.mulf %16, %16 : vector<32x8xf32>
    %cst_10 = arith.constant dense<0.000000e+00> : vector<32xf32>
    %21 = vector.multi_reduction <add>, %20, %cst_10 [1] : vector<32x8xf32> to vector<32xf32>
    %22 = vector.shape_cast %21 : vector<32xf32> to vector<32x1xf32>
    %23 = arith.addf %19, %22 : vector<32x1xf32>
    %cst_11 = arith.constant 6.250000e-02 : f32
    %24 = vector.broadcast %cst_11 : f32 to vector<32x1xf32>
    %25 = arith.mulf %23, %24 : vector<32x1xf32>
    %cst_12 = arith.constant 9.99999974E-6 : f32
    %26 = vector.broadcast %cst_12 : f32 to vector<32x1xf32>
    %27 = arith.addf %25, %26 : vector<32x1xf32>
    %28 = math.rsqrt %27 : vector<32x1xf32>
    %29 = vector.broadcast %28 : vector<32x1xf32> to vector<32x8xf32>
    %30 = arith.mulf %14, %29 : vector<32x8xf32>
    %31 = vector.broadcast %28 : vector<32x1xf32> to vector<32x8xf32>
    %32 = arith.mulf %16, %31 : vector<32x8xf32>
    %c0_13 = arith.constant 0 : index
    %c0_14 = arith.constant 0 : index
    %33 = vector.load %arg3[%c0_13, %c0_14] : memref<8x128xf32, #tpu.memory_space<vmem>>, vector<8x128xf32>
    %cst_15 = arith.constant dense<0.000000e+00> : vector<32x128xf32>
    %34 = tpu.matmul %30, %33, %cst_15 {dimension_numbers = #tpu.dot_dimension_numbers<[1], [0], [0], [1], [0, 0, 1, 1], [], []>} : vector<32x8xf32>, vector<8x128xf32>, vector<32x128xf32> -> vector<32x128xf32>
    %c0_16 = arith.constant 0 : index
    %c0_17 = arith.constant 0 : index
    %35 = vector.load %arg4[%c0_16, %c0_17] : memref<8x128xf32, #tpu.memory_space<vmem>>, vector<8x128xf32>
    %cst_18 = arith.constant dense<0.000000e+00> : vector<32x128xf32>
    %36 = tpu.matmul %32, %35, %cst_18 {dimension_numbers = #tpu.dot_dimension_numbers<[1], [0], [0], [1], [0, 0, 1, 1], [], []>} : vector<32x8xf32>, vector<8x128xf32>, vector<32x128xf32> -> vector<32x128xf32>
    %37 = arith.addf %34, %36 : vector<32x128xf32>
    %c0_19 = arith.constant 0 : index
    %c0_20 = arith.constant 0 : index
    %38 = vector.load %arg5[%c0_19, %c0_20] : memref<1x128xf32, #tpu.memory_space<vmem>>, vector<1x128xf32>
    %39 = vector.broadcast %38 : vector<1x128xf32> to vector<32x128xf32>
    %40 = arith.addf %37, %39 : vector<32x128xf32>
    %c0_21 = arith.constant 0 : index
    %c0_22 = arith.constant 0 : index
    %41 = vector.load %arg6[%c0_21, %c0_22] : memref<32x128xf32, #tpu.memory_space<vmem>>, vector<32x128xf32>
    tpu.vector_store %arg6[%c0_21, %c0_22], %40 {strides = array<i32>} : memref<32x128xf32, #tpu.memory_space<vmem>>, vector<32x128xf32>,
    return
  }
  func.func @transform_0(%arg0: i32) -> (i32, i32, i32, i32) {
    %c0_i32 = arith.constant 0 : i32
    %c0_i32_0 = arith.constant 0 : i32
    %c0_i32_1 = arith.constant 0 : i32
    %c0_i32_2 = arith.constant 0 : i32
    return %arg0, %c0_i32, %c0_i32_0, %c0_i32_1 : i32, i32, i32, i32
  }
  func.func @transform_1(%arg0: i32) -> (i32, i32, i32, i32) {
    %c1_i32 = arith.constant 1 : i32
    %c0_i32 = arith.constant 0 : i32
    %c0_i32_0 = arith.constant 0 : i32
    %c0_i32_1 = arith.constant 0 : i32
    return %arg0, %c1_i32, %c0_i32, %c0_i32_0 : i32, i32, i32, i32
  }
  func.func @transform_2(%arg0: i32) -> (i32, i32) {
    %c0_i32 = arith.constant 0 : i32
    %c0_i32_0 = arith.constant 0 : i32
    %c0_i32_1 = arith.constant 0 : i32
    return %c0_i32, %c0_i32_0 : i32, i32
  }
  func.func @transform_3(%arg0: i32) -> (i32, i32) {
    %c0_i32 = arith.constant 0 : i32
    %c0_i32_0 = arith.constant 0 : i32
    %c0_i32_1 = arith.constant 0 : i32
    return %c0_i32, %c0_i32_0 : i32, i32
  }
  func.func @transform_4(%arg0: i32) -> (i32, i32) {
    %c0_i32 = arith.constant 0 : i32
    %c0_i32_0 = arith.constant 0 : i32
    %c0_i32_1 = arith.constant 0 : i32
    return %c0_i32, %c0_i32_0 : i32, i32
  }
  func.func @transform_5(%arg0: i32) -> (i32, i32) {
    %c0_i32 = arith.constant 0 : i32
    %c0_i32_0 = arith.constant 0 : i32
    return %arg0, %c0_i32 : i32, i32
  }
}

</mosaic_0001>

<bundles_post_ra>
// kernel: patch_merging_forward.1
= control target key start
LH: loop header
LB: loop body
LE: loop exit
PB: predicated region body
PF: predicated region fallthrough
CT: control target
= control target key end

     0   :  { %s893_s18 = smov 0   ;;  %s895_s19 = smov 0   ;;  %s1026_s0 = inlined_call_operand.vmem [shape: f32[16,2,8,8], index: 0, kind: input, shape index: {}, may-alias: {0,1}]   ;;  %s1027_s1 = inlined_call_operand.vmem [shape: f32[16,2,8,8], index: 1, kind: input, shape index: {}, may-alias: {0,1}]   ;;  %s1028_s2 = inlined_call_operand.vmem [shape: f32[8,128], index: 2, kind: input, shape index: {}]   ;;  %s1029_s3 = inlined_call_operand.vmem [shape: f32[8,128], index: 3, kind: input, shape index: {}]   ;;  %s1030_s4 = inlined_call_operand.vmem [shape: f32[1,128], index: 4, kind: input, shape index: {}]   ;;  %s1031_s5 = inlined_call_operand.vmem [shape: f32[128,128], index: 5, kind: output, shape index: {}]  }
   0x1   :  { %s897_s20 = smov 0  }
   0x2 LB: > { %s743_s21 = sadd.s32 4294967295, %s861_s20   ;;  %s910_s22 = sadd.s32 1, %s861_s20   ;;  %s861_s20 = sphi %s897_s20, %s1035_s20   ;;  %s857_s19 = sphi %s895_s19, %s1034_s19   ;;  %s853_s18 = sphi %s893_s18, %s1033_s18  }
   0x3   : > { %s19_s23 = ssub.s32 %s861_s20, %s910_s22  ;;  %s22_s24 = sadd.s32 1, %s857_s19 }
   0x4   : > { %p20_p0 = scmp.eq.s32.totalorder %s19_s23, 0  ;;  %p29_p1 = scmp.ne.s32.totalorder %s857_s19, %s853_s18 }
   0x5   : > { %p30_p2 = scmp.eq.s32.totalorder %s861_s20, 0  ;;  %p746_p4 = scmp.ge.s32.totalorder %s861_s20, 4 }
   0x6   : > { %s919_s25 = scalar_select %p20_p0, %s857_s19, %s22_s24  }
   0x7   : > { %p921_p3 = por %p30_p2, %p29_p1  ;;  %179 = sbr.rel (%p746_p4) target bundleno = 28 (0x1c), region = 28 }
   0xe   : > { %182 = sbr.rel (!%p921_p3) target bundleno = 21 (0x15), region = 32  ;;  %s184_s27 = sand.u32 (%p921_p3), 1, %s857_s19  }
   0xf   : > { %s775_s28 = sshll.u32 (%p921_p3), %s861_s20, 6  ;;  %s747_s29 = sshll.u32 (%p921_p3), %s184_s27, 5 }
  0x10   : > { %s190_s7 = scalar_lea.vmem (%p921_p3), %s1026_s0, %s775_s28  ;;  %s186_s8 = scalar_lea.vmem (%p921_p3), [#allocation2], %s747_s29 }
  0x11   : > { %v224_v0 = vld [vmem:[%s190_s7] sm:$0xff] (%p921_p3)  ;;  %v226_v1 = vld [vmem:[%s190_s7 + $0x10] sm:$0xff] (%p921_p3) }
  0x12   : > { %v228_v2 = vld [vmem:[%s190_s7 + $0x20] sm:$0xff] (%p921_p3)  ;;  %225 = vst [vmem:[%s186_s8] sm:$0xff] (%p921_p3), %v224_v0  ;;  %227 = vst [vmem:[%s186_s8 + $0x8] sm:$0xff] (%p921_p3), %v226_v1  ;;  %v230_v3 = vld [vmem:[%s190_s7 + $0x30] sm:$0xff] (%p921_p3) }
  0x13   : > { %229 = vst [vmem:[%s186_s8 + $0x10] sm:$0xff] (%p921_p3), %v228_v2  ;;  %231 = vst [vmem:[%s186_s8 + $0x18] sm:$0xff] (%p921_p3), %v230_v3 }
  0x15 PF: > { %237 = sbr.rel (!%p921_p3) target bundleno = 28 (0x1c), region = 70  ;;  %s239_s9 = sand.u32 (%p921_p3), 1, %s857_s19  }
  0x16   : > { %s776_s10 = sshll.u32 (%p921_p3), %s861_s20, 6  ;;  %s751_s11 = sshll.u32 (%p921_p3), %s239_s9, 5 }
  0x17   : > { %s691_s14 = scalar_lea.vmem (%p921_p3), %s1027_s1, %s776_s10  ;;  %s241_s15 = scalar_lea.vmem (%p921_p3), [#allocation3], %s751_s11 }
  0x18   : > { %v754_v4 = vld [vmem:[%s691_s14 + $0x8] sm:$0xff] (%p921_p3)  ;;  %v755_v5 = vld [vmem:[%s691_s14 + $0x18] sm:$0xff] (%p921_p3) }
  0x19   : > { %v756_v6 = vld [vmem:[%s691_s14 + $0x28] sm:$0xff] (%p921_p3)  ;;  %281 = vst [vmem:[%s241_s15] sm:$0xff] (%p921_p3), %v754_v4  ;;  %283 = vst [vmem:[%s241_s15 + $0x8] sm:$0xff] (%p921_p3), %v755_v5  ;;  %v757_v7 = vld [vmem:[%s691_s14 + $0x38] sm:$0xff] (%p921_p3) }
  0x1a   : > { %285 = vst [vmem:[%s241_s15 + $0x10] sm:$0xff] (%p921_p3), %v756_v6  ;;  %287 = vst [vmem:[%s241_s15 + $0x18] sm:$0xff] (%p921_p3), %v757_v7 }
  0x1c PF: > { %p758_p5 = scmp.ge.s32.totalorder %s861_s20, 1  ;;  %p292_p6 = scmp.lt.s32.totalorder %s861_s20, 5 }
  0x1e   : > { %p293_p7 = pnand %p758_p5, %p292_p6 }
  0x1f   : > { %s299_s16 = sand.u32 (!%p293_p7), 1, %s853_s18   ;;  %vm353_vm0 = vcmask (!%p293_p7), 64512   ;;  %v451_v0 = vld [vmem:[%s1029_s3] sm:$0xff] (!%p293_p7)  ;;  %s761_s29 = sshll.u32 (!%p293_p7), %s743_s21, 2 }
  0x20   : > { %296 = sbr.rel (%p293_p7) target bundleno = 582 (0x246), region = 108  ;;  %s759_s17 = sshll.u32 (!%p293_p7), %s299_s16, 5  ;;  %v450_v1 = vld [vmem:[%s1028_s2] sm:$0xff] (!%p293_p7)  ;;  %787 = vmatprep.subr.mxu1 (!%p293_p7), %v451_v0 }
  0x21   : > { %s301_s23 = scalar_lea.vmem (!%p293_p7), [#allocation2], %s759_s17  ;;  %s308_s24 = scalar_lea.vmem (!%p293_p7), [#allocation3], %s759_s17  ;;  %795 = vmatprep.subr.mxu0 (!%p293_p7), %v450_v1  ;;  %788 = vmatpush3.msra.mxu1 (!%p293_p7), %v451_v0 }
  0x22   : > { %v346_v8 = vld [vmem:[%s301_s23 + $0x8] sm:$0xff] (!%p293_p7)  ;;  %v345_v9 = vld [vmem:[%s301_s23] sm:$0xff] (!%p293_p7)  ;;  %v351_v16 = vld [vmem:[%s308_s24 + $0x10] sm:$0xff] (!%p293_p7)  ;;  %796 = vmatpush3.msra.mxu0 (!%p293_p7), %v450_v1  ;;  %p340_p8 = scmp.lt.s32.totalorder (!%p293_p7), %s761_s29, 15 }
  0x23   : > { %v350_v10 = vld [vmem:[%s308_s24 + $0x8] sm:$0xff] (!%p293_p7)  ;;  %v357_v11 = vsel (!%p293_p7), %vm353_vm0, %v346_v8, 0.0  ;;  %v354_v12 = vsel (!%p293_p7), %vm353_vm0, %v345_v9, 0.0  ;;  %v349_v13 = vld [vmem:[%s308_s24] sm:$0xff] (!%p293_p7)  ;;  %v347_v17 = vld [vmem:[%s301_s23 + $0x10] sm:$0xff] (!%p293_p7)  ;;  %v372_v18 = vsel (!%p293_p7), %vm353_vm0, %v351_v16, 0.0 }
  0x24   : > { %358 = vadd.xlane.f32.xlu1 (!%p293_p7), %v357_v11  ;;  %355 = vadd.xlane.f32.xlu0 (!%p293_p7), %v354_v12  ;;  %v369_v14 = vsel (!%p293_p7), %vm353_vm0, %v350_v10, 0.0  ;;  %v366_v15 = vsel (!%p293_p7), %vm353_vm0, %v349_v13, 0.0  ;;  %v360_v19 = vsel (!%p293_p7), %vm353_vm0, %v347_v17, 0.0  ;;  %v352_v20 = vld [vmem:[%s308_s24 + $0x18] sm:$0xff] (!%p293_p7) }
  0x25   : > { %v348_v21 = vld [vmem:[%s301_s23 + $0x18] sm:$0xff] (!%p293_p7)  ;;  %v375_v22 = vsel (!%p293_p7), %vm353_vm0, %v352_v20, 0.0 }
  0x26   : > { %v363_v23 = vsel (!%p293_p7), %vm353_vm0, %v348_v21, 0.0 }
  0x27   : > { %s1037_s29 = smov (!%p340_p8, %s761_s29), 15 }
  0x28   : > { %370 = vadd.xlane.f32.xlu1 %v369_v14  ;;  %367 = vadd.xlane.f32.xlu0 %v366_v15  ;;  %s762_s30 = sshll.u32 %s1037_s29, 3 }
  0x29   : > { %s343_s10 = scalar_lea.vmem %s1031_s5, %s762_s30 }
  0x2c   : > { %373 = vadd.xlane.f32.xlu1 %v372_v18  ;;  %361 = vadd.xlane.f32.xlu0 %v360_v19 }
  0x30   : > { %376 = vadd.xlane.f32.xlu1 %v375_v22  ;;  %364 = vadd.xlane.f32.xlu0 %v363_v23 }
  0xb1   : > { %v359_v24 = vpop.xlane.xlu1 %358  ;;  %v356_v25 = vpop.xlane.xlu0 %355 }
  0xb5   : > { %v371_v26 = vpop.xlane.xlu1 %370  ;;  %v368_v27 = vpop.xlane.xlu0 %367 }
  0xb6   : > { %v379_v28 = vadd.f32 %v371_v26, %v359_v24  ;;  %v378_v29 = vadd.f32 %v368_v27, %v356_v25 }
  0xb8   : > { %v383_v30 = vmul.f32 0.0625, %v379_v28  ;;  %v382_v31 = vmul.f32 0.0625, %v378_v29 }
  0xb9   : > { %v374_v32 = vpop.xlane.xlu1 %373  ;;  %v362_v33 = vpop.xlane.xlu0 %361 }
  0xba   : > { %v951_v34 = vsub.f32 %v346_v8, %v383_v30  ;;  %v953_v35 = vsub.f32 %v350_v10, %v383_v30  ;;  %v955_v36 = vsub.f32 %v345_v9, %v382_v31  ;;  %v957_v37 = vsub.f32 %v349_v13, %v382_v31 }
  0xbb   : > { %v380_v38 = vadd.f32 %v374_v32, %v362_v33 }
  0xbc   : > { %v410_v39 = vmul.f32 %v957_v37, %v957_v37  ;;  %v394_v40 = vmul.f32 %v955_v36, %v955_v36  ;;  %v411_v44 = vmul.f32 %v953_v35, %v953_v35  ;;  %v395_v48 = vmul.f32 %v951_v34, %v951_v34 }
  0xbd   : > { %v384_v41 = vmul.f32 0.0625, %v380_v38  ;;  %v377_v42 = vpop.xlane.xlu1 %376  ;;  %v365_v43 = vpop.xlane.xlu0 %364 }
  0xbe   : > { %v414_v45 = vsel %vm353_vm0, %v410_v39, 0.0  ;;  %v398_v46 = vsel %vm353_vm0, %v394_v40, 0.0  ;;  %v381_v47 = vadd.f32 %v377_v42, %v365_v43  ;;  %v417_v56 = vsel %vm353_vm0, %v411_v44, 0.0 }
  0xbf   : > { %v969_v49 = vsub.f32 %v347_v17, %v384_v41  ;;  %v971_v50 = vsub.f32 %v351_v16, %v384_v41  ;;  %415 = vadd.xlane.f32.xlu1 %v414_v45  ;;  %399 = vadd.xlane.f32.xlu0 %v398_v46  ;;  %v401_v57 = vsel %vm353_vm0, %v395_v48, 0.0 }
  0xc0   : > { %v385_v51 = vmul.f32 0.0625, %v381_v47 }
  0xc1   : > { %v412_v52 = vmul.f32 %v971_v50, %v971_v50  ;;  %v396_v53 = vmul.f32 %v969_v49, %v969_v49 }
  0xc2   : > { %v977_v54 = vsub.f32 %v348_v21, %v385_v51  ;;  %v393_v55 = vsub.f32 %v352_v20, %v385_v51 }
  0xc3   : > { %418 = vadd.xlane.f32.xlu1 %v417_v56  ;;  %402 = vadd.xlane.f32.xlu0 %v401_v57  ;;  %v420_v58 = vsel %vm353_vm0, %v412_v52, 0.0  ;;  %v404_v59 = vsel %vm353_vm0, %v396_v53, 0.0 }
  0xc4   : > { %v413_v60 = vmul.f32 %v393_v55, %v393_v55  ;;  %v397_v61 = vmul.f32 %v977_v54, %v977_v54 }
  0xc6   : > { %v423_v62 = vsel %vm353_vm0, %v413_v60, 0.0  ;;  %v407_v63 = vsel %vm353_vm0, %v397_v61, 0.0 }
  0xc7   : > { %421 = vadd.xlane.f32.xlu1 %v420_v58  ;;  %405 = vadd.xlane.f32.xlu0 %v404_v59 }
  0xcb   : > { %424 = vadd.xlane.f32.xlu1 %v423_v62  ;;  %408 = vadd.xlane.f32.xlu0 %v407_v63 }
 0x14c   : > { %v416_v2 = vpop.xlane.xlu1 %415  ;;  %v400_v3 = vpop.xlane.xlu0 %399 }
 0x14d   : > { %v426_v4 = vadd.f32 %v416_v2, %v400_v3 }
 0x14f   : > { %v430_v5 = vmul.f32 0.0625, %v426_v4 }
 0x150   : > { %v419_v6 = vpop.xlane.xlu1 %418  ;;  %v403_v7 = vpop.xlane.xlu0 %402 }
 0x151   : > { %v434_v8 = vadd.f32 1e-05, %v430_v5  ;;  %v427_v9 = vadd.f32 %v419_v6, %v403_v7 }
 0x153   : > { %831 = vrsqrt.f32 %v434_v8  ;;  %v431_v10 = vmul.f32 0.0625, %v427_v9 }
 0x154   : > { %v422_v11 = vpop.xlane.xlu1 %421  ;;  %v406_v12 = vpop.xlane.xlu0 %405 }
 0x155   : > { %v435_v13 = vadd.f32 1e-05, %v431_v10  ;;  %v428_v14 = vadd.f32 %v422_v11, %v406_v12 }
 0x157   : > { %833 = vrsqrt.f32 %v435_v13  ;;  %v432_v15 = vmul.f32 0.0625, %v428_v14 }
 0x158   : > { %v425_v16 = vpop.xlane.xlu1 %424  ;;  %v409_v17 = vpop.xlane.xlu0 %408 }
 0x159   : > { %v436_v18 = vadd.f32 1e-05, %v432_v15  ;;  %v429_v19 = vadd.f32 %v425_v16, %v409_v17 }
 0x15b   : > { %835 = vrsqrt.f32 %v436_v18  ;;  %v433_v20 = vmul.f32 0.0625, %v429_v19 }
 0x15d   : > { %v832_v21 = vpop.eup %831  ;;  %v437_v22 = vadd.f32 1e-05, %v433_v20 }
 0x15e   : > { %v446_v23 = vmul.f32 %v832_v21, %v957_v37  ;;  %v442_v24 = vmul.f32 %v832_v21, %v955_v36  ;;  %v771_v36 = vld [vmem:[%s1030_s4] ss:$0 sm:$0xff] }
 0x15f   : > { %837 = vrsqrt.f32 %v437_v22 }
 0x160   : > { %789 = vmatprep.mubr.msk.f32.mxu1 %vm353_vm0, %v446_v23  ;;  %797 = vmatprep.mubr.msk.f32.mxu0 %vm353_vm0, %v442_v24 }
 0x161   : > { %v834_v25 = vpop.eup %833 }
 0x162   : > { %v447_v26 = vmul.f32 %v834_v25, %v953_v35  ;;  %v443_v27 = vmul.f32 %v834_v25, %v951_v34 }
 0x164   : > { %790 = vmatmul.mubr.msk.f32.vlgmr.msra.gmra.mrb[0].mxu1 %vm353_vm0, %v447_v26  ;;  %798 = vmatmul.mubr.msk.f32.vlgmr.msra.gmra.mrb[0].mxu0 %vm353_vm0, %v443_v27 }
 0x165   : > { %v836_v28 = vpop.eup %835 }
 0x166   : > { %v448_v29 = vmul.f32 %v836_v28, %v971_v50  ;;  %v444_v30 = vmul.f32 %v836_v28, %v969_v49 }
 0x168   : > { %792 = vmatprep.mubr.msk.f32.mxu1 %vm353_vm0, %v448_v29  ;;  %800 = vmatprep.mubr.msk.f32.mxu0 %vm353_vm0, %v444_v30 }
 0x169   : > { %v838_v31 = vpop.eup %837 }
 0x16a   : > { %v449_v32 = vmul.f32 %v838_v31, %v393_v55  ;;  %v445_v33 = vmul.f32 %v838_v31, %v977_v54 }
 0x16c   : > { %793 = vmatmul.mubr.msk.f32.gmra.mrb[2].mxu1 %vm353_vm0, %v449_v32  ;;  %801 = vmatmul.mubr.msk.f32.gmra.mrb[2].mxu0 %vm353_vm0, %v445_v33 }
 0x237   : > { %v791_v34 = vpop.f32.mrb[0].mxu1  ;;  %v799_v35 = vpop.f32.mrb[0].mxu0 }
 0x238   : > { %v633_v37 = vadd.f32 %v799_v35, %v791_v34  ;;  %v530_v38 = vpop.f32.mrb[1].mxu1  ;;  %v627_v39 = vpop.f32.mrb[1].mxu0 }
 0x239   : > { %v628_v40 = vadd.f32 %v627_v39, %v530_v38 }
 0x23a   : > { %v654_v41 = vadd.f32 %v771_v36, %v633_v37 }
 0x23b   : > { %v653_v42 = vadd.f32 %v771_v36, %v628_v40 }
 0x23c   : > { %658 = vst [vmem:[%s343_s10 + $0x8] sm:$0xff] %v654_v41 }
 0x23d   : > { %657 = vst [vmem:[%s343_s10] sm:$0xff] %v653_v42 }
 0x23f   : > { %v794_v43 = vpop.f32.mrb[2].mxu1  ;;  %v802_v44 = vpop.f32.mrb[2].mxu0 }
 0x240   : > { %v643_v45 = vadd.f32 %v802_v44, %v794_v43  ;;  %v540_v46 = vpop.f32.mrb[3].mxu1  ;;  %v637_v47 = vpop.f32.mrb[3].mxu0 }
 0x241   : > { %v638_v48 = vadd.f32 %v637_v47, %v540_v46 }
 0x242   : > { %v656_v49 = vadd.f32 %v771_v36, %v643_v45 }
 0x243   : > { %v655_v50 = vadd.f32 %v771_v36, %v638_v48 }
 0x244   : > { %660 = vst [vmem:[%s343_s10 + $0x18] sm:$0xff] %v656_v49 }
 0x245   : > { %659 = vst [vmem:[%s343_s10 + $0x10] sm:$0xff] %v655_v50 }
 0x246 PF: > { %p12_p9 = scmp.ge.s32.totalorder %s910_s22, 6   ;;  %s1033_s18 = smov %s857_s19 }
 0x247   : > { %s1034_s19 = smov %s919_s25  ;;  %s1035_s20 = smov %s910_s22 }
 0x248   :  { %14 = sbr.rel (!%p12_p9) target bundleno = 2 (0x2), region = 159 }

</bundles_post_ra>
